<compile_context>
chip_gen: v6e
topology: v6e:2x2x1
jax: 0.10.0
libtpu: 0.0.40
codegen_flags: <defaults>
</compile_context>

<pallas_src>
import functools
import math

import jax
import jax.numpy as jnp
from jax.experimental import pallas as pl
from jax.experimental.pallas import tpu as pltpu

_EPS_NORM = 1e-12             # F.normalize default eps
_EPS_COS = 1e-8               # F.cosine_similarity default eps (reference only)
_EPS_SQ = _EPS_NORM * _EPS_NORM


# ---------------------------------------------------------------------------
# Kernels
# ---------------------------------------------------------------------------
def _act_kernel(x_ref, a_scaled_ref, o_ref):
    """Non-multihead: out = renorm(normalize(normalize(x) - alpha*a_hat)).

    a_scaled == alpha * a_hat is precomputed in the wrapper (grid-invariant).
    ||y|| == 1 by construction, so the final rescale is the original row norm;
    norm is recovered as sumsq * rsqrt(sumsq) to avoid a second sqrt.
    """
    x = x_ref[...].astype(jnp.float32)                 # [T, H]
    a_scaled = a_scaled_ref[...]                       # [1, H] (f32)

    sumsq = jnp.sum(x * x, axis=-1, keepdims=True)     # [T, 1]
    inv_norm = jax.lax.rsqrt(jnp.maximum(sumsq, _EPS_SQ))
    norm = sumsq * inv_norm                            # == ||x|| (0 when x == 0)

    d = x * inv_norm - a_scaled
    inv_d = jax.lax.rsqrt(jnp.maximum(
        jnp.sum(d * d, axis=-1, keepdims=True), _EPS_SQ))

    o_ref[...] = (d * (inv_d * norm)).astype(o_ref.dtype)


def _act_kernel_multihead_3d(x_ref, a_hat_ref, o_ref, *, alpha, inv_sqrt_nh):
    """Multihead, head_size % 128 == 0: lane-dense [T, nh, hs] tiles.

    Per-head reductions are native last-axis sums; a_hat is unit per head so
    cos = sum(x*a_hat) * rsqrt(||x||^2) (eps folded to the normalize eps, only
    differs for near-zero rows).  Merged new_norm == sqrt(num_heads).
    """
    x = x_ref[...].astype(jnp.float32)                 # [T, nh, hs]
    a_hat = a_hat_ref[...]                             # [1, nh, hs] (f32, unit/head)

    x_sq_h = jnp.sum(x * x, axis=-1, keepdims=True)    # [T, nh, 1]
    inv_x = jax.lax.rsqrt(jnp.maximum(x_sq_h, _EPS_SQ))
    norm_full = jnp.sqrt(jnp.sum(x_sq_h, axis=-2, keepdims=True))   # [T, 1, 1]

    cos = jnp.sum(x * a_hat, axis=-1, keepdims=True) * inv_x        # [T, nh, 1]
    alpha_lam = alpha + alpha * jnp.maximum(cos, 0.0)

    d = x * inv_x - alpha_lam * a_hat
    scale = jax.lax.rsqrt(jnp.maximum(
        jnp.sum(d * d, axis=-1, keepdims=True), _EPS_SQ)) * (norm_full * inv_sqrt_nh)

    o_ref[...] = (d * scale).astype(o_ref.dtype)


def _act_kernel_multihead_2d(x_ref, a_hat_ref, oh_ref, oht_ref, o_ref, *,
                             alpha, inv_sqrt_nh):
    """Multihead, head_size % 128 != 0: lane-dense 2D [T, H] tiles.

    Per-head reductions go through (x*x) @ onehot[H, nh_pad] on the otherwise
    idle MXU; per-head scalars are broadcast back with onehot.T.  Padded head
    columns are zero in onehot, so their garbage rsqrt values never propagate.
    """
    x = x_ref[...].astype(jnp.float32)                 # [T, H]
    a_hat = a_hat_ref[...]                             # [1, H] (per-head unit)
    oh = oh_ref[...]                                   # [H, nh_pad]
    oht = oht_ref[...]                                 # [nh_pad, H]

    norm_full = jnp.sqrt(jnp.sum(x * x, axis=-1, keepdims=True))          # [T, 1]

    x_sq_h = jnp.dot(x * x, oh, preferred_element_type=jnp.float32)       # [T, nh_pad]
    inv_x_h = jax.lax.rsqrt(jnp.maximum(x_sq_h, _EPS_SQ))

    xa_h = jnp.dot(x * a_hat, oh, preferred_element_type=jnp.float32)
    alpha_lam_h = alpha + alpha * jnp.maximum(xa_h * inv_x_h, 0.0)

    inv_x = jnp.dot(inv_x_h, oht, preferred_element_type=jnp.float32)      # [T, H]
    alpha_lam = jnp.dot(alpha_lam_h, oht, preferred_element_type=jnp.float32)

    d = x * inv_x - alpha_lam * a_hat
    d_sq_h = jnp.dot(d * d, oh, preferred_element_type=jnp.float32)
    inv_d_h = jax.lax.rsqrt(jnp.maximum(d_sq_h, _EPS_SQ))
    inv_d = jnp.dot(inv_d_h, oht, preferred_element_type=jnp.float32)

    o_ref[...] = (d * (inv_d * (norm_full * inv_sqrt_nh))).astype(o_ref.dtype)


# ---------------------------------------------------------------------------
# Wrapper
# ---------------------------------------------------------------------------
def _vmem_budget(vmem_target_bytes):
    """Generation-aware sizing: (vmem_limit cap, row-tile sizing target)."""
    try:
        phys = int(pltpu.get_tpu_info().vmem_capacity_bytes)
    except Exception:          # no query available: assume smallest (v7x-like)
        phys = 64 << 20
    if phys >= (100 << 20):    # v5e / v6e: 128 MiB per TensorCore
        cap, target = 100 << 20, 64 << 20
    else:                      # v7x-class: 64 MiB per TensorCore
        cap, target = 44 << 20, 28 << 20
    if vmem_target_bytes is not None:
        target = int(vmem_target_bytes)
    return cap, target


def _choose_tile_rows(rows, H, itemsize, tile_rows, vmem_target_bytes):
    """Biggest row tile under the VMEM target, then balanced for megacore."""
    row_align = max(8, 32 // max(itemsize, 1))     # sublane packing per dtype
    rows_ceil = pl.cdiv(rows, row_align) * row_align
    if tile_rows is not None:                      # explicit override
        t = max(row_align, (int(tile_rows) // row_align) * row_align)
        return min(t, rows_ceil)
    # Honest footprint: double-buffered in+out pipeline copies (native dtype)
    # plus ~6 full-tile f32 intermediates live in the kernel body.
    per_row_bytes = H * (4 * itemsize + 6 * 4)
    t = int(min(vmem_target_bytes // max(per_row_bytes, 1), 4096))
    t = max(row_align, (t // row_align) * row_align)
    t = min(t, rows_ceil)
    # Grid balance: target >= 8 roughly equal "parallel" steps (v7x: 2 TCs share
    # the axis), but never shrink below ~512 rows (per-step overhead ~0.35us)
    # unless the whole problem is smaller than that.
    balanced = pl.cdiv(pl.cdiv(rows, 8), row_align) * row_align
    min_tile = min(rows_ceil, 512)
    t = min(t, max(balanced, min_tile, row_align))
    return max(row_align, min(t, rows_ceil))


def act_layer_forward(x, acts, alpha, num_heads=None, is_multihead=False,
                      tile_rows=None, vmem_target_bytes=None):
    """JAX/Pallas equivalent of ActLayer.forward(x, is_multihead)."""
    if acts is None:
        return x

    B, S, H = x.shape
    dtype = x.dtype
    rows = B * S
    itemsize = jnp.dtype(dtype).itemsize

    cap_bytes, target_bytes = _vmem_budget(vmem_target_bytes)
    tile = _choose_tile_rows(rows, H, itemsize, tile_rows, target_bytes)
    grid = (pl.cdiv(rows, tile),)        # ragged last block handled by Pallas

    pipe_bytes = 4 * tile * H * itemsize        # (in + out) x double-buffer
    interm_bytes = 6 * tile * H * 4             # live f32 temporaries allowance

    def _limit(extra_bytes):
        return int(min(cap_bytes,
                       max(16 << 20,
                           pipe_bytes + interm_bytes + extra_bytes + (2 << 20))))

    a = acts.reshape(-1).astype(jnp.float32)    # [H]

    if is_multihead:
        assert num_heads is not None and H % num_heads == 0
        hs = H // num_heads
        a3 = a.reshape(1, num_heads, hs)
        a_sq = jnp.sum(a3 * a3, axis=-1, keepdims=True)
        a_hat3 = a3 * jax.lax.rsqrt(jnp.maximum(a_sq, _EPS_SQ))
        inv_sqrt_nh = 1.0 / math.sqrt(num_heads)

        if hs % 128 == 0:
            # Lane-dense 3D layout; native per-head (last-axis) reductions.
            cparams = pltpu.CompilerParams(
                dimension_semantics=("parallel",),
                vmem_limit_bytes=_limit(2 * H * 4))
            kernel = functools.partial(_act_kernel_multihead_3d,
                                       alpha=float(alpha),
                                       inv_sqrt_nh=inv_sqrt_nh)
            out = pl.pallas_call(
                kernel,
                out_shape=jax.ShapeDtypeStruct((rows, num_heads, hs), dtype),
                grid=grid,
                in_specs=[
                    pl.BlockSpec((tile, num_heads, hs), lambda i: (i, 0, 0)),
                    pl.BlockSpec((1, num_heads, hs), lambda i: (0, 0, 0)),
                ],
                out_specs=pl.BlockSpec((tile, num_heads, hs),
                                       lambda i: (i, 0, 0)),
                compiler_params=cparams,
            )(x.reshape(rows, num_heads, hs), a_hat3)
            return out.reshape(B, S, H)

        # head_size not 128-aligned: stay lane-dense 2D; per-head reductions and
        # broadcast-backs via one-hot matmuls on the MXU (hidden under HBM time).
        nh_pad = max(128, pl.cdiv(num_heads, 128) * 128)
        head_of = jnp.repeat(jnp.arange(num_heads, dtype=jnp.int32), hs)    # [H]
        oh = (head_of[:, None] ==
              jnp.arange(nh_pad, dtype=jnp.int32)[None, :]).astype(jnp.float32)
        oht = jnp.transpose(oh)                                             # [nh_pad, H]
        a_hat2 = a_hat3.reshape(1, H)

        extra = 2 * (H * 4 + 2 * H * nh_pad * 4) + 6 * tile * nh_pad * 4
        cparams = pltpu.CompilerParams(
            dimension_semantics=("parallel",),
            vmem_limit_bytes=_limit(extra))
        kernel = functools.partial(_act_kernel_multihead_2d,
                                   alpha=float(alpha),
                                   inv_sqrt_nh=inv_sqrt_nh)
        out = pl.pallas_call(
            kernel,
            out_shape=jax.ShapeDtypeStruct((rows, H), dtype),
            grid=grid,
            in_specs=[
                pl.BlockSpec((tile, H), lambda i: (i, 0)),
                pl.BlockSpec((1, H), lambda i: (0, 0)),
                pl.BlockSpec((H, nh_pad), lambda i: (0, 0)),
                pl.BlockSpec((nh_pad, H), lambda i: (0, 0)),
            ],
            out_specs=pl.BlockSpec((tile, H), lambda i: (i, 0)),
            compiler_params=cparams,
        )(x.reshape(rows, H), a_hat2, oh, oht)
        return out.reshape(B, S, H)

    # ---- non-multihead path ----
    a2 = a.reshape(1, H)
    a_sq = jnp.sum(a2 * a2, axis=-1, keepdims=True)
    a_scaled = (float(alpha) * a2) * jax.lax.rsqrt(jnp.maximum(a_sq, _EPS_SQ))

    cparams = pltpu.CompilerParams(
        dimension_semantics=("parallel",),
        vmem_limit_bytes=_limit(2 * H * 4))
    out = pl.pallas_call(
        _act_kernel,
        out_shape=jax.ShapeDtypeStruct((rows, H), dtype),
        grid=grid,
        in_specs=[
            pl.BlockSpec((tile, H), lambda i: (i, 0)),
            pl.BlockSpec((1, H), lambda i: (0, 0)),
        ],
        out_specs=pl.BlockSpec((tile, H), lambda i: (i, 0)),
        compiler_params=cparams,
    )(x.reshape(rows, H), a_scaled)
    return out.reshape(B, S, H)


# ---------------------------------------------------------------------------
# Pure-JAX reference (mirrors the PyTorch forward)
# ---------------------------------------------------------------------------
def _ref_forward(x, acts, alpha, num_heads=None, is_multihead=False):
    xf = x.astype(jnp.float32)
    norm = jnp.linalg.norm(xf, axis=-1, keepdims=True)
    a = acts.reshape(-1).astype(jnp.float32)
    if not is_multihead:
        a_hat = a / jnp.maximum(jnp.linalg.norm(a), _EPS_NORM)
        x_hat = xf / jnp.maximum(norm, _EPS_NORM)
        d = x_hat - alpha * a_hat
        y = d / jnp.maximum(jnp.linalg.norm(d, axis=-1, keepdims=True), _EPS_NORM)
        new_norm = jnp.linalg.norm(y, axis=-1, keepdims=True)
        return (y * (norm / new_norm)).astype(x.dtype)
    B, S, H = x.shape
    hs = H // num_heads
    x4 = xf.reshape(B, S, num_heads, hs)
    a4 = a.reshape(1, 1, num_heads, hs)
    xn = jnp.linalg.norm(x4, axis=-1, keepdims=True)
    an = jnp.linalg.norm(a4, axis=-1, keepdims=True)
    cos = jnp.sum(x4 * a4, axis=-1, keepdims=True) / jnp.maximum(xn * an, _EPS_COS)
    lam = 1.0 + jnp.maximum(cos, 0.0)
    a_hat = a4 / jnp.maximum(an, _EPS_NORM)
    x_hat = x4 / jnp.maximum(xn, _EPS_NORM)
    d = x_hat - alpha * lam * a_hat
    y = d / jnp.maximum(jnp.linalg.norm(d, axis=-1, keepdims=True), _EPS_NORM)
    y = y.reshape(B, S, H)
    new_norm = jnp.linalg.norm(y, axis=-1, keepdims=True)
    return (y * (norm / new_norm)).astype(x.dtype)


if __name__ == "__main__":
    key = jax.random.PRNGKey(0)
    alpha = 0.5
    B, S, H, NH = 2, 8, 32, 4

    kx, ka, kx2, kx3, ka3 = jax.random.split(key, 5)
    x = jax.random.normal(kx, (B, S, H), dtype=jnp.float32)
    acts = jax.random.normal(ka, (1, H), dtype=jnp.float32)

    # default (is_multihead=False) path
    out = jax.block_until_ready(act_layer_forward(x, acts, alpha))
    ref = _ref_forward(x, acts, alpha)
    assert out.shape == x.shape and out.dtype == x.dtype
    assert jnp.allclose(out, ref, atol=1e-4, rtol=1e-4), "non-multihead mismatch"

    # multihead, head_size (=8) not 128-aligned -> 2D one-hot MXU path
    out_mh = jax.block_until_ready(
        act_layer_forward(x, acts, alpha, num_heads=NH, is_multihead=True))
    ref_mh = _ref_forward(x, acts, alpha, num_heads=NH, is_multihead=True)
    assert jnp.allclose(out_mh, ref_mh, atol=1e-4, rtol=1e-4), "multihead-2d mismatch"

    # multihead, head_size == 128 -> lane-dense 3D path
    H3, NH3 = 256, 2
    x3 = jax.random.normal(kx3, (B, S, H3), dtype=jnp.float32)
    acts3 = jax.random.normal(ka3, (1, H3), dtype=jnp.float32)
    out3 = jax.block_until_ready(
        act_layer_forward(x3, acts3, alpha, num_heads=NH3, is_multihead=True))
    ref3 = _ref_forward(x3, acts3, alpha, num_heads=NH3, is_multihead=True)
    assert jnp.allclose(out3, ref3, atol=1e-4, rtol=1e-4), "multihead-3d mismatch"

    # ragged last block: B*S = 10 rows is not sublane-aligned
    x_r = jax.random.normal(kx2, (B, 5, H), dtype=jnp.float32)
    out_r = jax.block_until_ready(act_layer_forward(x_r, acts, alpha))
    assert jnp.allclose(out_r, _ref_forward(x_r, acts, alpha),
                        atol=1e-4, rtol=1e-4), "ragged mismatch"
    out_r_mh = jax.block_until_ready(
        act_layer_forward(x_r, acts, alpha, num_heads=NH, is_multihead=True))
    assert jnp.allclose(
        out_r_mh, _ref_forward(x_r, acts, alpha, num_heads=NH, is_multihead=True),
        atol=1e-4, rtol=1e-4), "ragged multihead mismatch"

    # acts is None -> identity passthrough
    assert jnp.array_equal(act_layer_forward(x, None, alpha), x)

    print("KERNEL_OK")
</pallas_src>

<mosaic_0001>
module attributes {stable_mosaic.version = 11 : i64} {
  func.func @_act_kernel(%arg0: i32, %arg1: memref<16x32xf32, #tpu.memory_space<vmem>>, %arg2: memref<1x32xf32, #tpu.memory_space<vmem>>, %arg3: memref<16x32xf32, #tpu.memory_space<vmem>>) attributes {dimension_semantics = [#tpu.dimension_semantics<parallel>], iteration_bounds = array<i64: 1>, scalar_prefetch = 0 : i64, scratch_operands = 0 : i64, tpu.core_type = #tpu.core_type<tc>, window_params = [{transform_indices = @transform_0, window_bounds = array<i64: 16, 32>}, {pipeline_mode = #tpu.pipeline_mode<synchronous>, transform_indices = @transform_1, window_bounds = array<i64: 1, 32>}, {transform_indices = @transform_2, window_bounds = array<i64: 16, 32>}]} {
    %c0 = arith.constant 0 : index
    %c0_0 = arith.constant 0 : index
    %0 = vector.load %arg1[%c0, %c0_0] : memref<16x32xf32, #tpu.memory_space<vmem>>, vector<16x32xf32>
    %c0_1 = arith.constant 0 : index
    %c0_2 = arith.constant 0 : index
    %1 = vector.load %arg2[%c0_1, %c0_2] : memref<1x32xf32, #tpu.memory_space<vmem>>, vector<1x32xf32>
    %2 = arith.mulf %0, %0 : vector<16x32xf32>
    %cst = arith.constant dense<0.000000e+00> : vector<16xf32>
    %3 = vector.multi_reduction <add>, %2, %cst [1] : vector<16x32xf32> to vector<16xf32>
    %4 = vector.shape_cast %3 : vector<16xf32> to vector<16x1xf32>
    %cst_3 = arith.constant 1.000000e-24 : f32
    %5 = vector.broadcast %cst_3 : f32 to vector<16x1xf32>
    %6 = arith.maximumf %4, %5 : vector<16x1xf32>
    %7 = math.rsqrt %6 : vector<16x1xf32>
    %8 = arith.mulf %4, %7 : vector<16x1xf32>
    %9 = vector.broadcast %7 : vector<16x1xf32> to vector<16x32xf32>
    %10 = arith.mulf %0, %9 : vector<16x32xf32>
    %11 = vector.broadcast %1 : vector<1x32xf32> to vector<16x32xf32>
    %12 = arith.subf %10, %11 : vector<16x32xf32>
    %13 = arith.mulf %12, %12 : vector<16x32xf32>
    %cst_4 = arith.constant dense<0.000000e+00> : vector<16xf32>
    %14 = vector.multi_reduction <add>, %13, %cst_4 [1] : vector<16x32xf32> to vector<16xf32>
    %15 = vector.shape_cast %14 : vector<16xf32> to vector<16x1xf32>
    %cst_5 = arith.constant 1.000000e-24 : f32
    %16 = vector.broadcast %cst_5 : f32 to vector<16x1xf32>
    %17 = arith.maximumf %15, %16 : vector<16x1xf32>
    %18 = math.rsqrt %17 : vector<16x1xf32>
    %19 = arith.mulf %18, %8 : vector<16x1xf32>
    %20 = vector.broadcast %19 : vector<16x1xf32> to vector<16x32xf32>
    %21 = arith.mulf %12, %20 : vector<16x32xf32>
    %c0_6 = arith.constant 0 : index
    %c0_7 = arith.constant 0 : index
    %22 = vector.load %arg3[%c0_6, %c0_7] : memref<16x32xf32, #tpu.memory_space<vmem>>, vector<16x32xf32>
    tpu.vector_store %arg3[%c0_6, %c0_7], %21 {strides = array<i32>} : memref<16x32xf32, #tpu.memory_space<vmem>>, vector<16x32xf32>,
    return
  }
  func.func @transform_0(%arg0: i32) -> (i32, i32) {
    %c0_i32 = arith.constant 0 : i32
    %c0_i32_0 = arith.constant 0 : i32
    return %arg0, %c0_i32 : i32, i32
  }
  func.func @transform_1(%arg0: i32) -> (i32, i32) {
    %c0_i32 = arith.constant 0 : i32
    %c0_i32_0 = arith.constant 0 : i32
    %c0_i32_1 = arith.constant 0 : i32
    return %c0_i32, %c0_i32_0 : i32, i32
  }
  func.func @transform_2(%arg0: i32) -> (i32, i32) {
    %c0_i32 = arith.constant 0 : i32
    %c0_i32_0 = arith.constant 0 : i32
    return %arg0, %c0_i32 : i32, i32
  }
}

</mosaic_0001>

<bundles_post_ra>
// kernel: tpu_custom_call.1
= control target key start
LH: loop header
LB: loop body
LE: loop exit
PB: predicated region body
PF: predicated region fallthrough
CT: control target
= control target key end

     0   :  { %7 = vsyncpa [#allocation3], 0  ;;  %s186_s0 = inlined_call_operand.hbm [shape: f32[16,32], index: 0, kind: input, shape index: {}]   ;;  %s187_s1 = inlined_call_operand.vmem [shape: f32[1,32], index: 1, kind: input, shape index: {}]   ;;  %s188_s2 = inlined_call_operand.hbm [shape: f32[16,32], index: 2, kind: output, shape index: {}]  }
   0x1   :  { %8 = vsyncpa [#allocation4], 0  ;;  %s146_s9 = smov [#allocation2]  }
   0x2   :  { %s14_s10 = sshll.u32 %s146_s9, 4  ;;  %s15_s10 = int_to_ptr.vmem [resolvable:$true] %s14_s10 }
   0x3   :  { %s110_s11 = scalar_lea.vmem %s15_s10, 256  ;;  %p115_p1 = scmp.lt.s32.totalorder %s15_s10, %s15_s10 }
   0x4   :  { %p111_p0 = scmp.ne.s32.totalorder %s15_s10, %s110_s11  ;;  %p116_p2 = scmp.lt.s32.totalorder %s110_s11, %s110_s11 }
   0x6   :  { %p117_p3 = por %p116_p2, %p115_p1 }
   0x8   :  { %p118_p4 = pnand %p117_p3, %p111_p0 }
   0xa   :  { %121 = shalt.err (!%p118_p4)
}
   0xb   :  { %s147_s12 = smov 128   ;;  %s148_s13 = smov 8  }
   0xc   :  { %20 = dma.hbm_to_vmem [thread:$0]  %s186_s0, 256, %s15_s10, [#allocation3], %s147_s12, %s147_s12, %s148_s13  }
   0xd   :  { %142 = dma.done.wait [#allocation3], 256  }
   0xe   :  { %143 = vsyncadd [#allocation3], 4294967040  ;;  %v26_v0 = vld [vmem:[#allocation2] sm:$0xff]  ;;  %vm31_vm0 = vcmask 261120   ;;  %v27_v1 = vld [vmem:[#allocation2 + $0x8] sm:$0xff] }
   0xf   :  { %v29_v2 = vmul.f32 %v26_v0, %v26_v0  ;;  %v30_v3 = vmul.f32 %v27_v1, %v27_v1  ;;  %v89_v11 = vld [vmem:[%s187_s1] ss:$0 sm:$0xff]  ;;  %s149_s1 = smov [#allocation5]  }
  0x10   :  { %s77_s17 = sshll.u32 %s149_s1, 4  ;;  %s78_s17 = int_to_ptr.vmem [resolvable:$true] %s77_s17 }
  0x11   :  { %v32_v4 = vsel %vm31_vm0, %v29_v2, 0.0  ;;  %v35_v5 = vsel %vm31_vm0, %v30_v3, 0.0  ;;  %s122_s18 = scalar_lea.vmem %s78_s17, 256  ;;  %p127_p6 = scmp.lt.s32.totalorder %s78_s17, %s78_s17 }
  0x12   :  { %33 = vadd.xlane.f32.xlu0 %v32_v4  ;;  %p123_p5 = scmp.ne.s32.totalorder %s78_s17, %s122_s18  ;;  %p128_p7 = scmp.lt.s32.totalorder %s122_s18, %s122_s18 }
  0x14   :  { %p129_p8 = por %p128_p7, %p127_p6 }
  0x16   :  { %36 = vadd.xlane.f32.xlu0 %v35_v5  ;;  %p130_p9 = pnand %p129_p8, %p123_p5 }
  0x9b   :  { %v34_v6 = vpop.xlane.xlu0 %33 }
  0x9c   :  { %v38_v7 = vmax.f32 %v34_v6, 1e-24 }
  0x9e   :  { %94 = vrsqrt.f32 %v38_v7 }
  0x9f   :  { %v37_v8 = vpop.xlane.xlu0 %36 }
  0xa0   :  { %v39_v9 = vmax.f32 %v37_v8, 1e-24 }
  0xa2   :  { %96 = vrsqrt.f32 %v39_v9 }
  0xab   :  { %v95_v10 = vpop.eup %94 }
  0xac   :  { %v42_v12 = vmul.f32 %v95_v10, %v34_v6  ;;  %v44_v13 = vmul.f32 %v95_v10, %v26_v0 }
  0xae   :  { %v52_v14 = vsub.f32 %v44_v13, %v89_v11 }
  0xaf   :  { %v97_v15 = vpop.eup %96 }
  0xb0   :  { %v43_v16 = vmul.f32 %v97_v15, %v37_v8  ;;  %v54_v17 = vmul.f32 %v52_v14, %v52_v14  ;;  %v45_v18 = vmul.f32 %v97_v15, %v27_v1 }
  0xb2   :  { %v56_v19 = vsel %vm31_vm0, %v54_v17, 0.0  ;;  %v53_v20 = vsub.f32 %v45_v18, %v89_v11 }
  0xb3   :  { %57 = vadd.xlane.f32.xlu1 %v56_v19 }
  0xb4   :  { %v55_v21 = vmul.f32 %v53_v20, %v53_v20 }
  0xb6   :  { %v59_v22 = vsel %vm31_vm0, %v55_v21, 0.0 }
  0xb7   :  { %60 = vadd.xlane.f32.xlu1 %v59_v22 }
 0x13c   :  { %v58_v23 = vpop.xlane.xlu1 %57 }
 0x13d   :  { %v62_v24 = vmax.f32 %v58_v23, 1e-24 }
 0x13f   :  { %98 = vrsqrt.f32 %v62_v24 }
 0x140   :  { %v61_v25 = vpop.xlane.xlu1 %60 }
 0x141   :  { %v63_v26 = vmax.f32 %v61_v25, 1e-24 }
 0x143   :  { %100 = vrsqrt.f32 %v63_v26 }
 0x14c   :  { %v99_v27 = vpop.eup %98 }
 0x14d   :  { %v66_v28 = vmul.f32 %v99_v27, %v42_v12 }
 0x14f   :  { %v68_v29 = vmul.f32 %v66_v28, %v52_v14 }
 0x150   :  { %v101_v30 = vpop.eup %100 }
 0x151   :  { %v67_v31 = vmul.f32 %v101_v30, %v43_v16  ;;  %70 = vst.msk [vmem:[#allocation5] sm:$0xff] %vm31_vm0, %v68_v29 }
 0x153   :  { %v69_v32 = vmul.f32 %v67_v31, %v53_v20 }
 0x155   :  { %71 = vst.msk [vmem:[#allocation5 + $0x8] sm:$0xff] %vm31_vm0, %v69_v32 }
 0x156   :  { %133 = shalt.err (!%p130_p9)
}
 0x157   :  { %83 = dma.vmem_to_hbm [thread:$0]  %s78_s17, 256, %s188_s2, [#allocation4], %s147_s12, %s147_s12, %s148_s13  }
 0x158   :  { %144 = dma.done.wait [#allocation4], 256  }
 0x159   :  { %145 = vsyncadd [#allocation4], 4294967040 }
 0x15a   :  { %87 = vsyncpa [#allocation3], 1 }
 0x15b   :  { %88 = vsyncpa [#allocation4], 1 }

</bundles_post_ra>
